<compile_context>
chip_gen: v7x
topology: tpu7x:2x2x1
jax: 0.10.0
libtpu: 0.0.40
codegen_flags: <defaults>
</compile_context>

<pallas_src>
import functools

import jax
import jax.numpy as jnp
from jax import lax
from jax.experimental import pallas as pl
from jax.experimental.pallas import tpu as pltpu


def _round_up(x, m):
    return (x + m - 1) // m * m


def _tile_m(m):
    if m <= 256:
        return _round_up(m, 8)
    for t in (256, 128):
        if m % t == 0:
            return t
    return 256  # will pad


def _tile_n(n):
    if n <= 256:
        return n
    for t in (256, 128):
        if n % t == 0:
            return t
    return 256  # will pad


def _tile_k(k):
    if k <= 512:
        return k
    for t in (512, 256, 128):
        if k % t == 0:
            return t
    return 512  # will pad (zero-pad along K is exact)


# --------------------------- tiled linear kernels --------------------------- #

def _matmul_kernel(x_ref, w_ref, o_ref, acc_ref, *, relu):
    @pl.when(pl.program_id(2) == 0)
    def _():
        acc_ref[...] = jnp.zeros_like(acc_ref)

    acc_ref[...] += jnp.dot(x_ref[...], w_ref[...],
                            preferred_element_type=jnp.float32)

    @pl.when(pl.program_id(2) == pl.num_programs(2) - 1)
    def _():
        out = acc_ref[...]
        if relu:
            out = jnp.maximum(out, 0.0)
        o_ref[...] = out.astype(o_ref.dtype)


def _matmul_bias_kernel(x_ref, w_ref, b_ref, o_ref, acc_ref, *, relu):
    @pl.when(pl.program_id(2) == 0)
    def _():
        acc_ref[...] = jnp.zeros_like(acc_ref)

    acc_ref[...] += jnp.dot(x_ref[...], w_ref[...],
                            preferred_element_type=jnp.float32)

    @pl.when(pl.program_id(2) == pl.num_programs(2) - 1)
    def _():
        out = acc_ref[...] + b_ref[...].astype(jnp.float32)
        if relu:
            out = jnp.maximum(out, 0.0)
        o_ref[...] = out.astype(o_ref.dtype)


def pallas_linear(x, w, b=None, *, relu=False, out_dtype=None):
    """y = relu?(x @ w + b)  --  tiled MXU matmul with f32 VMEM accumulator."""
    M, K = x.shape
    K2, N = w.shape
    assert K == K2
    out_dtype = out_dtype or x.dtype

    tm, tn, tk = _tile_m(M), _tile_n(N), _tile_k(K)
    Mp, Np, Kp = _round_up(M, tm), _round_up(N, tn), _round_up(K, tk)

    if (Mp, Kp) != (M, K):
        x = jnp.pad(x, ((0, Mp - M), (0, Kp - K)))
    if (Kp, Np) != (K, N):
        w = jnp.pad(w, ((0, Kp - K), (0, Np - N)))

    has_bias = b is not None
    in_specs = [
        pl.BlockSpec((tm, tk), lambda i, j, k: (i, k)),
        pl.BlockSpec((tk, tn), lambda i, j, k: (k, j)),
    ]
    args = [x, w]
    if has_bias:
        b2 = b.reshape(1, N)
        if Np != N:
            b2 = jnp.pad(b2, ((0, 0), (0, Np - N)))
        in_specs.append(pl.BlockSpec((1, tn), lambda i, j, k: (0, j)))
        args.append(b2)
        kernel = functools.partial(_matmul_bias_kernel, relu=relu)
    else:
        kernel = functools.partial(_matmul_kernel, relu=relu)

    itemsize = jnp.dtype(x.dtype).itemsize
    cost = pl.CostEstimate(
        flops=2 * Mp * Kp * Np,
        transcendentals=0,
        bytes_accessed=(Mp * Kp + Kp * Np + Mp * Np) * itemsize,
    )

    out = pl.pallas_call(
        kernel,
        out_shape=jax.ShapeDtypeStruct((Mp, Np), out_dtype),
        grid=(Mp // tm, Np // tn, Kp // tk),
        in_specs=in_specs,
        out_specs=pl.BlockSpec((tm, tn), lambda i, j, k: (i, j)),
        scratch_shapes=[pltpu.VMEM((tm, tn), jnp.float32)],
        compiler_params=pltpu.CompilerParams(
            dimension_semantics=("parallel", "parallel", "arbitrary"),
            vmem_limit_bytes=32 * 1024 * 1024,
        ),
        cost_estimate=cost,
    )(*args)

    if (Mp, Np) != (M, N):
        out = out[:M, :N]
    return out


# ---------------------- scaled dot-product attention ------------------------ #

def _attn_kernel(q_ref, k_ref, v_ref, o_ref, p_ref, *, scale):
    q = q_ref[0, 0].astype(jnp.float32) * scale                      # (Sq, dk)
    k = k_ref[0, 0].astype(jnp.float32)                              # (Sk, dk)
    s = lax.dot_general(q, k, (((1,), (1,)), ((), ())),
                        preferred_element_type=jnp.float32)          # (Sq, Sk)
    m = jnp.max(s, axis=-1, keepdims=True)
    e = jnp.exp(s - m)
    p = e / jnp.sum(e, axis=-1, keepdims=True)
    p_ref[0, 0] = p.astype(p_ref.dtype)
    o_ref[0, 0] = jnp.dot(p, v_ref[0, 0].astype(jnp.float32),
                          preferred_element_type=jnp.float32).astype(o_ref.dtype)


def _attn_kernel_masked(q_ref, k_ref, v_ref, m_ref, o_ref, p_ref, *, scale):
    q = q_ref[0, 0].astype(jnp.float32) * scale
    k = k_ref[0, 0].astype(jnp.float32)
    s = lax.dot_general(q, k, (((1,), (1,)), ((), ())),
                        preferred_element_type=jnp.float32)
    s = jnp.where(m_ref[0] == 0, -1e9, s)                            # masked_fill
    m = jnp.max(s, axis=-1, keepdims=True)
    e = jnp.exp(s - m)
    p = e / jnp.sum(e, axis=-1, keepdims=True)
    p_ref[0, 0] = p.astype(p_ref.dtype)
    o_ref[0, 0] = jnp.dot(p, v_ref[0, 0].astype(jnp.float32),
                          preferred_element_type=jnp.float32).astype(o_ref.dtype)


def pallas_attention(q, k, v, mask, temperature):
    """q,k,v: (B, H, S, d).  Returns (output (B,H,Sq,dv), attn (B,H,Sq,Sk))."""
    B, H, Sq, dk = q.shape
    Sk, dv = k.shape[2], v.shape[3]
    scale = 1.0 / float(temperature)

    in_specs = [pl.BlockSpec((1, 1, Sq, dk), lambda b, h: (b, h, 0, 0)),
                pl.BlockSpec((1, 1, Sk, dk), lambda b, h: (b, h, 0, 0)),
                pl.BlockSpec((1, 1, Sk, dv), lambda b, h: (b, h, 0, 0))]
    args = [q, k, v]
    if mask is not None:
        in_specs.append(pl.BlockSpec((1, Sq, Sk), lambda b, h: (b, 0, 0)))
        args.append(mask)
        kernel = functools.partial(_attn_kernel_masked, scale=scale)
    else:
        kernel = functools.partial(_attn_kernel, scale=scale)

    return pl.pallas_call(
        kernel,
        out_shape=(jax.ShapeDtypeStruct((B, H, Sq, dv), q.dtype),
                   jax.ShapeDtypeStruct((B, H, Sq, Sk), jnp.float32)),
        grid=(B, H),
        in_specs=in_specs,
        out_specs=(pl.BlockSpec((1, 1, Sq, dv), lambda b, h: (b, h, 0, 0)),
                   pl.BlockSpec((1, 1, Sq, Sk), lambda b, h: (b, h, 0, 0))),
        compiler_params=pltpu.CompilerParams(
            dimension_semantics=("parallel", "parallel"),
            vmem_limit_bytes=32 * 1024 * 1024,
        ),
    )(*args)


# ---------------------- fused residual add + LayerNorm ---------------------- #

def _res_ln_kernel(x_ref, r_ref, g_ref, b_ref, o_ref, *, eps):
    x = x_ref[...].astype(jnp.float32) + r_ref[...].astype(jnp.float32)
    mu = jnp.mean(x, axis=-1, keepdims=True)
    xc = x - mu
    var = jnp.mean(xc * xc, axis=-1, keepdims=True)
    inv = lax.rsqrt(var + eps)
    y = xc * inv * g_ref[...].astype(jnp.float32) + b_ref[...].astype(jnp.float32)
    o_ref[...] = y.astype(o_ref.dtype)


def pallas_residual_layernorm(x, residual, gamma, beta, *, eps=1e-6):
    M, D = x.shape
    tr = 256 if M > 256 else _round_up(M, 8)
    Mp = _round_up(M, tr)
    if Mp != M:
        x = jnp.pad(x, ((0, Mp - M), (0, 0)))
        residual = jnp.pad(residual, ((0, Mp - M), (0, 0)))
    g2 = gamma.reshape(1, D)
    b2 = beta.reshape(1, D)

    out = pl.pallas_call(
        functools.partial(_res_ln_kernel, eps=eps),
        out_shape=jax.ShapeDtypeStruct((Mp, D), x.dtype),
        grid=(Mp // tr,),
        in_specs=[pl.BlockSpec((tr, D), lambda i: (i, 0)),
                  pl.BlockSpec((tr, D), lambda i: (i, 0)),
                  pl.BlockSpec((1, D), lambda i: (0, 0)),
                  pl.BlockSpec((1, D), lambda i: (0, 0))],
        out_specs=pl.BlockSpec((tr, D), lambda i: (i, 0)),
        compiler_params=pltpu.CompilerParams(
            dimension_semantics=("parallel",),
            vmem_limit_bytes=32 * 1024 * 1024,
        ),
    )(x, residual, g2, b2)

    if Mp != M:
        out = out[:M]
    return out


# --------------------------------- module ----------------------------------- #

class EncoderLayerPallas:
    def __init__(self, n_heads, d_model, d_inner, d_k, d_v,
                 dropout_rate=0.1, temperature=0.0, *, key=None, dtype=jnp.float32):
        self.n_heads, self.d_model, self.d_inner = n_heads, d_model, d_inner
        self.d_k, self.d_v = d_k, d_v
        self.dropout_rate = dropout_rate  # identity in eval-mode forward
        self.dtype = dtype
        if temperature < 1e-8:
            temperature = d_k ** 0.5
        self.temperature = float(temperature)

        if key is None:
            key = jax.random.PRNGKey(0)
        ks = jax.random.split(key, 10)

        def _uniform(k, shape, fan_in):
            bound = 1.0 / (fan_in ** 0.5)
            return jax.random.uniform(k, shape, dtype, minval=-bound, maxval=bound)

        # Linear weights stored as (in_features, out_features): y = x @ W (+ b).
        self.w_qs = _uniform(ks[0], (d_model, n_heads * d_k), d_model)
        self.w_ks = _uniform(ks[1], (d_model, n_heads * d_k), d_model)
        self.w_vs = _uniform(ks[2], (d_model, n_heads * d_v), d_model)
        self.w_fc = _uniform(ks[3], (n_heads * d_v, d_model), n_heads * d_v)
        # Pre-fused projection matrices (one MXU pass instead of three / two).
        self.w_qkv = jnp.concatenate([self.w_qs, self.w_ks, self.w_vs], axis=1)
        self.w_kv = jnp.concatenate([self.w_ks, self.w_vs], axis=1)

        self.ln1_g = 1.0 + 0.1 * jax.random.normal(ks[4], (d_model,), dtype)
        self.ln1_b = 0.1 * jax.random.normal(ks[5], (d_model,), dtype)

        self.w1 = _uniform(ks[6], (d_model, d_inner), d_model)
        self.b1 = _uniform(ks[7], (d_inner,), d_model)
        self.w2 = _uniform(ks[8], (d_inner, d_model), d_inner)
        self.b2 = _uniform(ks[9], (d_model,), d_inner)
        self.ln2_g = jnp.ones((d_model,), dtype)
        self.ln2_b = jnp.zeros((d_model,), dtype)

    def __call__(self, enc_input, enc_input_kv=None, slf_attn_mask=None):
        x = enc_input
        kv = enc_input_kv if enc_input_kv is not None else enc_input
        B, Sq, D = x.shape
        Sk = kv.shape[1]
        H, dk, dv = self.n_heads, self.d_k, self.d_v
        assert D == self.d_model

        residual = x.reshape(B * Sq, D)

        # ---- Q/K/V projections (fused matmuls) ----
        if enc_input_kv is None:
            qkv = pallas_linear(residual, self.w_qkv)
            q = qkv[:, : H * dk]
            k = qkv[:, H * dk: 2 * H * dk]
            v = qkv[:, 2 * H * dk:]
        else:
            kv2 = kv.reshape(B * Sk, D)
            q = pallas_linear(residual, self.w_qs)
            kvp = pallas_linear(kv2, self.w_kv)
            k = kvp[:, : H * dk]
            v = kvp[:, H * dk:]

        q = q.reshape(B, Sq, H, dk).transpose(0, 2, 1, 3)
        k = k.reshape(B, Sk, H, dk).transpose(0, 2, 1, 3)
        v = v.reshape(B, Sk, H, dv).transpose(0, 2, 1, 3)

        mask = None
        if slf_attn_mask is not None:
            mask = jnp.broadcast_to(slf_attn_mask, (B, Sq, Sk)).astype(jnp.int32)

        # ---- attention (returns full attn matrix, as the PyTorch module does) ----
        o, attn = pallas_attention(q, k, v, mask, self.temperature)

        # ---- output projection + residual + LayerNorm ----
        o = o.transpose(0, 2, 1, 3).reshape(B * Sq, H * dv)
        o = pallas_linear(o, self.w_fc)
        h = pallas_residual_layernorm(o, residual, self.ln1_g, self.ln1_b, eps=1e-6)

        # ---- position-wise feed-forward ----
        f = pallas_linear(h, self.w1, self.b1, relu=True)
        f = pallas_linear(f, self.w2, self.b2)
        out = pallas_residual_layernorm(f, h, self.ln2_g, self.ln2_b, eps=1e-6)

        return out.reshape(B, Sq, D), attn


# ------------------------------ pure-JAX reference --------------------------- #

def _layernorm_ref(x, g, b, eps):
    mu = jnp.mean(x, axis=-1, keepdims=True)
    var = jnp.mean((x - mu) ** 2, axis=-1, keepdims=True)
    return (x - mu) * lax.rsqrt(var + eps) * g + b


def reference_encoder_layer(layer, x, kv=None, mask=None):
    if kv is None:
        kv = x
    B, Sq, D = x.shape
    Sk = kv.shape[1]
    H, dk, dv = layer.n_heads, layer.d_k, layer.d_v

    residual = x
    q = (x @ layer.w_qs).reshape(B, Sq, H, dk).transpose(0, 2, 1, 3)
    k = (kv @ layer.w_ks).reshape(B, Sk, H, dk).transpose(0, 2, 1, 3)
    v = (kv @ layer.w_vs).reshape(B, Sk, H, dv).transpose(0, 2, 1, 3)

    s = (q / layer.temperature) @ jnp.swapaxes(k, 2, 3)
    if mask is not None:
        m = jnp.broadcast_to(mask, (B, Sq, Sk))[:, None, :, :]
        s = jnp.where(m == 0, -1e9, s)
    p = jax.nn.softmax(s, axis=-1)
    o = p @ v
    o = o.transpose(0, 2, 1, 3).reshape(B, Sq, H * dv)
    o = o @ layer.w_fc + residual
    h = _layernorm_ref(o, layer.ln1_g, layer.ln1_b, 1e-6)

    f = jnp.maximum(h @ layer.w1 + layer.b1, 0.0) @ layer.w2 + layer.b2
    out = _layernorm_ref(f + h, layer.ln2_g, layer.ln2_b, 1e-6)
    return out, p


# ---------------------------------- main ------------------------------------- #

if __name__ == "__main__":
    jax.config.update("jax_default_matmul_precision", "highest")

    key = jax.random.PRNGKey(0)
    k_x, k_kv, k_par = jax.random.split(key, 3)

    B, S, H, D, DK, DV, D_INNER = 2, 16, 4, 128, 32, 32, 256
    x = jax.random.normal(k_x, (B, S, D), jnp.float32)

    layer = EncoderLayerPallas(H, D, D_INNER, DK, DV, key=k_par)

    # --- self-attention path (enc_input_kv=None, no mask): fused QKV projection ---
    out, attn = layer(x)
    jax.block_until_ready((out, attn))
    ref_out, ref_attn = reference_encoder_layer(layer, x)
    assert out.shape == (B, S, D) and attn.shape == (B, H, S, S)
    assert jnp.allclose(out, ref_out, atol=1e-3, rtol=1e-3)
    assert jnp.allclose(attn, ref_attn, atol=1e-3, rtol=1e-3)

    # --- cross-attention path with a key-padding mask ---
    kv = jax.random.normal(k_kv, (B, S, D), jnp.float32)
    lengths = jnp.array([S, S - 4], jnp.int32)
    mask = (jnp.arange(S)[None, None, :] < lengths[:, None, None]).astype(jnp.int32)
    mask = jnp.broadcast_to(mask, (B, S, S))

    out2, attn2 = layer(x, kv, mask)
    jax.block_until_ready((out2, attn2))
    ref_out2, ref_attn2 = reference_encoder_layer(layer, x, kv, mask)
    assert jnp.allclose(out2, ref_out2, atol=1e-3, rtol=1e-3)
    assert jnp.allclose(attn2, ref_attn2, atol=1e-3, rtol=1e-3)

    print("KERNEL_OK")
</pallas_src>

<mosaic_0001>
module attributes {stable_mosaic.version = 11 : i64} {
  func.func @_matmul_kernel(%arg0: i32, %arg1: i32, %arg2: i32, %arg3: memref<32x128xf32, #tpu.memory_space<vmem>>, %arg4: memref<128x128xf32, #tpu.memory_space<vmem>>, %arg5: memref<32x128xf32, #tpu.memory_space<vmem>>, %arg6: memref<32x128xf32, #tpu.memory_space<vmem>>) attributes {dimension_semantics = [#tpu.dimension_semantics<parallel>, #tpu.dimension_semantics<parallel>, #tpu.dimension_semantics<arbitrary>], iteration_bounds = array<i64: 1, 3, 1>, scalar_prefetch = 0 : i64, scratch_operands = 1 : i64, tpu.core_type = #tpu.core_type<tc>, window_params = [{transform_indices = @transform_0, window_bounds = array<i64: 32, 128>}, {transform_indices = @transform_1, window_bounds = array<i64: 128, 128>}, {transform_indices = @transform_2, window_bounds = array<i64: 32, 128>}]} {
    %c0_i32 = arith.constant 0 : i32
    %0 = arith.cmpi eq, %arg2, %c0_i32 : i32
    %1 = arith.extui %0 : i1 to i32
    %c0_i32_0 = arith.constant 0 : i32
    %2 = arith.cmpi ne, %1, %c0_i32_0 : i32
    scf.if %2 {
      %cst_10 = arith.constant 0.000000e+00 : f32
      %12 = vector.broadcast %cst_10 : f32 to vector<32x128xf32>
      %c0_11 = arith.constant 0 : index
      %c0_12 = arith.constant 0 : index
      %13 = vector.load %arg6[%c0_11, %c0_12] : memref<32x128xf32, #tpu.memory_space<vmem>>, vector<32x128xf32>
      tpu.vector_store %arg6[%c0_11, %c0_12], %12 {strides = array<i32>} : memref<32x128xf32, #tpu.memory_space<vmem>>, vector<32x128xf32>,
    } else {
    }
    %c0 = arith.constant 0 : index
    %c0_1 = arith.constant 0 : index
    %3 = vector.load %arg6[%c0, %c0_1] : memref<32x128xf32, #tpu.memory_space<vmem>>, vector<32x128xf32>
    %c0_2 = arith.constant 0 : index
    %c0_3 = arith.constant 0 : index
    %4 = vector.load %arg3[%c0_2, %c0_3] : memref<32x128xf32, #tpu.memory_space<vmem>>, vector<32x128xf32>
    %c0_4 = arith.constant 0 : index
    %c0_5 = arith.constant 0 : index
    %5 = vector.load %arg4[%c0_4, %c0_5] : memref<128x128xf32, #tpu.memory_space<vmem>>, vector<128x128xf32>
    %cst = arith.constant dense<0.000000e+00> : vector<32x128xf32>
    %6 = tpu.matmul %4, %5, %cst {dimension_numbers = #tpu.dot_dimension_numbers<[1], [0], [0], [1], [0, 0, 1, 1], [], []>, precision = #tpu.contract_precision<fp32>} : vector<32x128xf32>, vector<128x128xf32>, vector<32x128xf32> -> vector<32x128xf32>
    %7 = arith.addf %3, %6 : vector<32x128xf32>
    %c0_6 = arith.constant 0 : index
    %c0_7 = arith.constant 0 : index
    %8 = vector.load %arg6[%c0_6, %c0_7] : memref<32x128xf32, #tpu.memory_space<vmem>>, vector<32x128xf32>
    tpu.vector_store %arg6[%c0_6, %c0_7], %7 {strides = array<i32>} : memref<32x128xf32, #tpu.memory_space<vmem>>, vector<32x128xf32>,
    %c0_i32_8 = arith.constant 0 : i32
    %9 = arith.cmpi eq, %arg2, %c0_i32_8 : i32
    %10 = arith.extui %9 : i1 to i32
    %c0_i32_9 = arith.constant 0 : i32
    %11 = arith.cmpi ne, %10, %c0_i32_9 : i32
    scf.if %11 {
      %c0_10 = arith.constant 0 : index
      %c0_11 = arith.constant 0 : index
      %12 = vector.load %arg6[%c0_10, %c0_11] : memref<32x128xf32, #tpu.memory_space<vmem>>, vector<32x128xf32>
      %c0_12 = arith.constant 0 : index
      %c0_13 = arith.constant 0 : index
      %13 = vector.load %arg5[%c0_12, %c0_13] : memref<32x128xf32, #tpu.memory_space<vmem>>, vector<32x128xf32>
      tpu.vector_store %arg5[%c0_12, %c0_13], %12 {strides = array<i32>} : memref<32x128xf32, #tpu.memory_space<vmem>>, vector<32x128xf32>,
    } else {
    }
    return
  }
  func.func @transform_0(%arg0: i32, %arg1: i32, %arg2: i32) -> (i32, i32) {
    %c0_i32 = arith.constant 0 : i32
    return %arg0, %arg2 : i32, i32
  }
  func.func @transform_1(%arg0: i32, %arg1: i32, %arg2: i32) -> (i32, i32) {
    %c0_i32 = arith.constant 0 : i32
    return %arg2, %arg1 : i32, i32
  }
  func.func @transform_2(%arg0: i32, %arg1: i32, %arg2: i32) -> (i32, i32) {
    %c0_i32 = arith.constant 0 : i32
    return %arg0, %arg1 : i32, i32
  }
}

</mosaic_0001>

<bundles_post_ra>
// kernel: tpu_custom_call.1
= control target key start
LH: loop header
LB: loop body
LE: loop exit
PB: predicated region body
PF: predicated region fallthrough
CT: control target
= control target key end

     0   :  { %7 = vsyncpa [#allocation4], 0  ;;  %s2500_s0 = inlined_call_operand.hbm [shape: f32[32,128], index: 0, kind: input, shape index: {}]   ;;  %s2501_s1 = inlined_call_operand.hbm [shape: f32[128,384], index: 1, kind: input, shape index: {}]   ;;  %s2502_s2 = inlined_call_operand.hbm [shape: f32[32,384], index: 2, kind: output, shape index: {}]  }
   0x1   :  { %8 = vsyncpa [#allocation7], 0 }
   0x2   :  { %10 = vsyncpa [#allocation7 + $0x1], 0 }
   0x3   :  { %11 = vsyncpa [#allocation5], 0 }
   0x4   :  { %13 = vsyncpa [#allocation5 + $0x1], 0  ;;  %s1981_s9 = smov 0   ;;  %s1983_s10 = smov 0  }
   0x5   :  { %s1985_s11 = smov 0   ;;  %s1987_s12 = smov 0  }
   0x6   :  { %s1989_s13 = smov 0   ;;  %s1991_s14 = smov 0  }
   0x7 LB: > { %s1157_s15 = sadd.s32 4294967295, %s1955_s14   ;;  %s1158_s16 = sadd.s32 4294967294, %s1955_s14   ;;  %s1955_s14 = sphi %s1991_s14, %s19_s14   ;;  %s1951_s13 = sphi %s1989_s13, %s2531_s13   ;;  %s1947_s12 = sphi %s1987_s12, %s2530_s12   ;;  %s1943_s11 = sphi %s1985_s11, %s2529_s11   ;;  %s1939_s10 = sphi %s1983_s10, %s2528_s10   ;;  %s1935_s9 = sphi %s1981_s9, %s2527_s9  }
   0x8   : > { %p82_p0 = scmp.ne.s32.totalorder %s1943_s11, %s1939_s10  ;;  %p83_p1 = scmp.eq.s32.totalorder %s1955_s14, 0 }
   0x9   : > { %p88_p2 = scmp.ne.s32.totalorder %s1939_s10, %s1935_s9  ;;  %p2018_p3 = scmp.eq.s32.totalorder %s1157_s15, 0 }
   0xa   : > { %p2022_p4 = por %p83_p1, %p82_p0  ;;  %p114_p5 = scmp.eq.s32.totalorder %s1157_s15, 2 }
   0xb   : > { %s2511_s17 = scalar_select %p2018_p3, 1, 0 }
   0xc   : > { %p2028_p6 = por %p2018_p3, %p88_p2  ;;  %p120_p7 = scmp.eq.s32.totalorder %s1158_s16, 2 }
   0xd   : > { %p2032_p8 = por %p114_p5, %p82_p0  ;;  %p1159_p9 = scmp.ge.s32.totalorder %s1955_s14, 1 }
   0xe   : > { %s2513_s19 = scalar_select %p2028_p6, 1, 0 }
   0xf   : > { %s2514_s20 = scalar_select %p2032_p8, 1, 0 }
  0x10   : > { %p2037_p10 = por %p120_p7, %p88_p2  ;;  %p127_p11 = scmp.lt.s32.totalorder %s1955_s14, 4 }
  0x11   : > { %s1957_s23 = smov [#allocation3]   ;;  %p1753_p0 = scmp.lt.s32.totalorder %s1955_s14, 3 }
  0x12   : > { %s2515_s21 = scalar_select %p2037_p10, 1, 0 }
  0x13   : > { %p2042_p12 = pnand %p1159_p9, %p127_p11  ;;  %s143_s24 = sshll.u32 %s1957_s23, 4  ;;  %s144_s24 = int_to_ptr.vmem [resolvable:$true] %s143_s24 }
  0x14   : > { %p2057_p2 = pnand %p1753_p0, %p2022_p4  ;;  %s34_s27 = sadd.s32 1, %s1951_s13 }
  0x15   : > { %s2516_s22 = scalar_select %p2042_p12, 1, 0 }
  0x16   : > { %p1740_p13 = pneg %p2042_p12  ;;  %s1811_s30 = scalar_lea.hbm %s2500_s0, 512 }
  0x17   : > { %s2518_s26 = scalar_select %p2057_p2, 1, 0 }
  0x18   : > { %p2051_p1 = pnand %p1740_p13, %p2018_p3  ;;  %p1812_p5 = scmp.ne.s32.totalorder %s2500_s0, %s1811_s30 }
  0x19   : > { %p1818_p4 = scmp.lt.u32.totalorder %s1811_s30, %s2500_s0 }
  0x1a   : > { %p1813_p7 = pneg %p2051_p1 }
  0x1c   : > { %p1814_p9 = pnand %p1813_p7, %p1812_p5 }
  0x1e   : > { %p1815_p11 = pneg %p1814_p9 }
  0x20   : > { %p1820_p13 = pnand %p1818_p4, %p1815_p11 }
  0x22   : > { %1823 = shalt.err (!%p1820_p13)
}
  0x23   : > { %s1824_s7 = scalar_lea.vmem %s144_s24, 512  ;;  %p1832_p6 = scmp.lt.s32.totalorder %s144_s24, %s144_s24 }
  0x24   : > { %p1825_p0 = scmp.ne.s32.totalorder %s144_s24, %s1824_s7  ;;  %p1833_p3 = scmp.lt.s32.totalorder %s1824_s7, %s1824_s7 }
  0x26   : > { %p1827_p10 = pnand %p1825_p0, %p1813_p7  ;;  %p1834_p12 = por %p1833_p3, %p1832_p6 }
  0x28   : > { %p1828_p8 = pneg %p1827_p10 }
  0x2a   : > { %p1835_p2 = pnand %p1834_p12, %p1828_p8 }
  0x2c   : > { %1838 = shalt.err (!%p1835_p2)
}
  0x2d   : > { %s1958_s8 = smov 128   ;;  %s1959_s15 = smov 8  }
  0x2e   : > { %1743 = dma.hbm_to_vmem [thread:$0]  (!%p2051_p1), %s2500_s0, 512, %s144_s24, [#allocation4], %s1958_s8, %s1958_s8, %s1959_s15  }
  0x2f   : > { %p36_p10 = scmp.ge.s32.totalorder %s34_s27, 3  ;;  %s75_s23 = sadd.s32 1, %s1943_s11 }
  0x30   : > { %s157_s28 = sand.u32 1, %s1943_s11   ;;  %s1163_s3 = sshll.u32 %s1951_s13, 7 }
  0x31   : > { %s2533_s27 = smov (%p36_p10, %s34_s27), 0  ;;  %s1162_s29 = sshll.u32 %s157_s28, 7 }
  0x32   : > { %s71_s30 = ssub.s32 %s1951_s13, %s2533_s27  ;;  %s2091_s5 = scalar_lea.hbm %s2501_s1, %s1163_s3 }
  0x33   : > { %p73_p3 = scmp.eq.s32.totalorder %s71_s30, 0  ;;  %s161_s24 = scalar_lea.vmem [#allocation6], %s1162_s29 }
  0x34   : > { %s170_s6 = sshll.u32 %s161_s24, 4  ;;  %s2098_s16 = scalar_lea.sflag [#allocation7], %s157_s28  ;;  %s2096_s6 = int_to_ptr.vmem [resolvable:$true] %s170_s6 }
  0x35   : > { %s2094_s7 = scalar_select %p73_p3, %s1943_s11, %s75_s23  }
  0x36   : > { %s1839_s18 = scalar_lea.hbm %s2091_s5, 2048  ;;  %p2519_p8 = scmp.ne.s32.totalorder %s2518_s26, 0 }
  0x37   : > { %p1840_p6 = scmp.ne.s32.totalorder %s2091_s5, %s1839_s18  ;;  %s1844_s25 = scalar_lea.hbm %s2501_s1, 6144 }
  0x38   : > { %p1841_p12 = pneg %p2519_p8  ;;  %p1845_p5 = scmp.lt.u32.totalorder %s2091_s5, %s2501_s1 }
  0x39   : > { %p1846_p7 = scmp.lt.u32.totalorder %s1844_s25, %s1839_s18  ;;  %p1848_p11 = scmp.lt.u32.totalorder %s1839_s18, %s2091_s5 }
  0x3a   : > { %p1842_p1 = pnand %p1841_p12, %p1840_p6 }
  0x3b   : > { %p1847_p9 = por %p1846_p7, %p1845_p5 }
  0x3c   : > { %p1843_p2 = pneg %p1842_p1 }
  0x3d   : > { %p1849_p4 = por %p1848_p11, %p1847_p9 }
  0x3f   : > { %p1850_p13 = pnand %p1849_p4, %p1843_p2 }
  0x41   : > { %1853 = shalt.err (!%p1850_p13)
}
  0x42   : > { %s1854_s23 = scalar_lea.vmem %s2096_s6, 2048  ;;  %s1960_s28 = smov [#allocation6]  }
  0x43   : > { %p1855_p0 = scmp.ne.s32.totalorder %s2096_s6, %s1854_s23  ;;  %s1859_s24 = sshll.u32 %s1960_s28, 4  ;;  %s1860_s24 = int_to_ptr.vmem [resolvable:$false] %s1859_s24 }
  0x44   : > { %s1861_s30 = scalar_lea.vmem %s1860_s24, 4096  ;;  %p1862_p6 = scmp.lt.s32.totalorder %s2096_s6, %s1860_s24 }
  0x45   : > { %p1857_p10 = pnand %p1855_p0, %p1841_p12  ;;  %p1863_p1 = scmp.lt.s32.totalorder %s1861_s30, %s1854_s23 }
  0x47   : > { %p1858_p3 = pneg %p1857_p10  ;;  %p1864_p5 = por %p1863_p1, %p1862_p6 }
  0x49   : > { %p1865_p7 = pnand %p1864_p5, %p1858_p3 }
  0x4b   : > { %1868 = shalt.err (!%p1865_p7)
}
  0x4c   : > { %s1961_s18 = smov 384   ;;  %p2520_p12 = scmp.ne.s32.totalorder %s2516_s22, 0 }
  0x4d   : > { %1747 = dma.hbm_to_vmem [thread:$0]  (!%p2519_p8), %s2091_s5, 2048, %s2096_s6, %s2098_s16, %s1961_s18, %s1958_s8, %s1959_s15  }
  0x4e   : > { %182 = sbr.rel (%p2520_p12) target bundleno = 426 (0x1aa), region = 28  ;;  %p2521_p2 = scmp.ne.s32.totalorder (!%p2520_p12), %s2511_s17, 0 }
  0x55   : > { %1922 = dma.done.wait (%p2521_p2), [#allocation4], 512  }
  0x56   : > { %1924 = vsyncadd (%p2521_p2), [#allocation4], 4294966784  ;;  %s2135_s3 = sand.u32 1, %s1939_s10   ;;  %p2522_p8 = scmp.ne.s32.totalorder %s2513_s19, 0 }
  0x57   : > { %s1166_s26 = sshll.u32 %s2135_s3, 7  ;;  %s189_s25 = scalar_lea.sflag [#allocation7], %s2135_s3 }
  0x58   : > { %s2139_s29 = scalar_lea.vmem [#allocation6], %s1166_s26 }
  0x59   : > { %1926 = dma.done.wait (%p2522_p8), %s189_s25, 2048  }
  0x5a   : > { %1928 = vsyncadd (%p2522_p8), %s189_s25, 4294965248  ;;  %v232_v0 = vld [vmem:[%s2139_s29] sm:$0xff]  ;;  %v233_v1 = vld [vmem:[%s2139_s29 + $0x8] sm:$0xff]  ;;  %s1167_s17 = sshll.u32 %s2135_s3, 5  ;;  %s1169_s8 = sshll.u32 %s1947_s12, 7 }
  0x5b   : > { %v234_v2 = vld [vmem:[%s2139_s29 + $0x10] sm:$0xff]  ;;  %v249_v3 = vand.u32 4294901760, %v232_v0  ;;  %v252_v4 = vand.u32 4294901760, %v233_v1  ;;  %v235_v5 = vld [vmem:[%s2139_s29 + $0x18] sm:$0xff]  ;;  %v2150_v7 = vld [vmem:[%s2139_s29 + $0x20] sm:$0xff]  ;;  %s212_s19 = scalar_lea.vmem [#allocation8], %s1167_s17  ;;  %s2452_s6 = scalar_lea.hbm %s2502_s2, %s1169_s8 }
  0x5c   : > { %v255_v6 = vand.u32 4294901760, %v234_v2  ;;  %v2153_v8 = vld [vmem:[%s2139_s29 + $0x28] sm:$0xff]  ;;  %v258_v9 = vand.u32 4294901760, %v235_v5  ;;  %v261_v11 = vand.u32 4294901760, %v2150_v7  ;;  %v2162_v14 = vld [vmem:[%s2139_s29 + $0x30] sm:$0xff]  ;;  %v2165_v15 = vld [vmem:[%s2139_s29 + $0x38] sm:$0xff] }
  0x5d   : > { %v2155_v10 = vpack.c.bf16 %v252_v4, %v249_v3  ;;  %v264_v12 = vand.u32 4294901760, %v2153_v8  ;;  %v228_v16 = vld [vmem:[#allocation3] sm:$0xff]  ;;  %v267_v19 = vand.u32 4294901760, %v2162_v14  ;;  %v270_v20 = vand.u32 4294901760, %v2165_v15  ;;  %v2187_v22 = vld [vmem:[%s2139_s29 + $0x48] sm:$0xff]  ;;  %v2206_v28 = vld [vmem:[%s2139_s29 + $0x50] sm:$0xff] }
  0x5e   : > { %v2159_v13 = vpack.c.bf16 %v258_v9, %v255_v6  ;;  %v2171_v17 = vand.u32 4294901760, %v228_v16  ;;  %v2184_v21 = vld [vmem:[%s2139_s29 + $0x40] sm:$0xff]  ;;  %v276_v27 = vand.u32 4294901760, %v2187_v22  ;;  %v2209_v29 = vld [vmem:[%s2139_s29 + $0x58] sm:$0xff]  ;;  %v279_v31 = vand.u32 4294901760, %v2206_v28  ;;  %v229_v33 = vld [vmem:[#allocation3 + $0x8] sm:$0xff] }
  0x5f   : > { %1521 = vmatprep.subr.bf16.mxu1 %v2155_v10  ;;  %1617 = vmatprep.subr.bf16.mxu0 %v2155_v10  ;;  %v2179_v18 = vpack.c.bf16 %v264_v12, %v261_v11  ;;  %v2201_v25 = vpack.c.bf16 %v270_v20, %v267_v19  ;;  %v273_v26 = vand.u32 4294901760, %v2184_v21  ;;  %v282_v35 = vand.u32 4294901760, %v2209_v29  ;;  %v2225_v36 = vld [vmem:[%s2139_s29 + $0x60] sm:$0xff]  ;;  %v2228_v37 = vld [vmem:[%s2139_s29 + $0x68] sm:$0xff]  ;;  %v2235_v40 = vld [vmem:[%s2139_s29 + $0x70] sm:$0xff]  ;;  %s1053_s22 = sshll.u32 %s212_s19, 4  ;;  %s2447_s22 = int_to_ptr.vmem [resolvable:$true] %s1053_s22 }
  0x60   : > { %1523 = vmatpush3.bf16.msra.mxu1 %v2155_v10  ;;  %1619 = vmatpush3.bf16.msra.mxu0 %v2155_v10  ;;  %v2190_v23 = vsub.f32 %v228_v16, %v2171_v17  ;;  %v2230_v38 = vsub.f32 %v232_v0, %v249_v3  ;;  %v2232_v39 = vsub.f32 %v233_v1, %v252_v4  ;;  %v2237_v41 = vand.u32 4294901760, %v229_v33  ;;  %v2248_v46 = vld [vmem:[%s2139_s29 + $0x78] sm:$0xff]  ;;  %v230_v55 = vld [vmem:[#allocation3 + $0x10] sm:$0xff]  ;;  %s1038_s12 = scalar_lea.sflag [#allocation5], %s2135_s3  ;;  %s1869_s16 = scalar_lea.vmem %s2447_s22, 512 }
  0x61   : > { %1525 = vmatprep.subr.bf16.mxu1 %v2159_v13  ;;  %1621 = vmatprep.subr.bf16.mxu0 %v2159_v13  ;;  %v2221_v34 = vpack.c.bf16 %v276_v27, %v273_v26  ;;  %v2239_v42 = vsub.f32 %v234_v2, %v255_v6  ;;  %v2241_v43 = vsub.f32 %v235_v5, %v258_v9  ;;  %v285_v44 = vand.u32 4294901760, %v2225_v36  ;;  %v231_v62 = vld [vmem:[#allocation3 + $0x18] sm:$0xff]  ;;  %p1870_p9 = scmp.ne.s32.totalorder %s2447_s22, %s1869_s16  ;;  %p2525_p11 = scmp.ne.s32.totalorder %s2514_s20, 0 }
  0x62   : > { %v331_v24 = vand.u32 4294901760, %v2190_v23  ;;  %v288_v45 = vand.u32 4294901760, %v2228_v37  ;;  %v2256_v47 = vpack.c.bf16 %v282_v35, %v279_v31  ;;  %v372_v48 = vand.u32 4294901760, %v2230_v38  ;;  %s1962_s4 = smov [#allocation8]  }
  0x63   : > { %v379_v49 = vand.u32 4294901760, %v2232_v39  ;;  %v2510_v50 = vand.u32 4294901760, %v2235_v40  ;;  %v2509_v51 = vand.u32 4294901760, %v2248_v46  ;;  %v2263_v52 = vsub.f32 %v229_v33, %v2237_v41  ;;  %p1871_p4 = pnand %p1870_p9, %p2525_p11  ;;  %s1873_s23 = sshll.u32 %s1962_s4, 4  ;;  %s1874_s23 = int_to_ptr.vmem [resolvable:$false] %s1873_s23 }
  0x64   : > { %1527 = vmatpush3.bf16.msra.mxu1 %v2159_v13  ;;  %1623 = vmatpush3.bf16.msra.mxu0 %v2159_v13  ;;  %v332_v30 = vsub.f32 %v2190_v23, %v331_v24  ;;  %v386_v53 = vand.u32 4294901760, %v2239_v42  ;;  %v393_v54 = vand.u32 4294901760, %v2241_v43  ;;  %v2273_v56 = vpack.c.bf16 %v288_v45, %v285_v44  ;;  %s1875_s28 = scalar_lea.vmem %s1874_s23, 1024  ;;  %p1876_p0 = scmp.lt.s32.totalorder %s2447_s22, %s1874_s23 }
  0x65   : > { %1529 = vmatprep.subr.bf16.mxu1 %v2179_v18  ;;  %1625 = vmatprep.subr.bf16.mxu0 %v2179_v18  ;;  %v2278_v57 = vsub.f32 %v2150_v7, %v261_v11  ;;  %v373_v58 = vsub.f32 %v2230_v38, %v372_v48  ;;  %v380_v59 = vsub.f32 %v2232_v39, %v379_v49  ;;  %v2289_v61 = vand.u32 4294901760, %v230_v55  ;;  %p1872_p13 = pneg %p1871_p4  ;;  %p1877_p10 = scmp.lt.s32.totalorder %s1875_s28, %s1869_s16 }
  0x66   : > { %1438 = vmatprep.mubr.f32.mxu0 %v331_v24  ;;  %v333_v32 = vand.u32 4294901760, %v332_v30  ;;  %v2287_v60 = vsub.f32 %v2153_v8, %v264_v12  ;;  %v2295_v63 = vpack.c.bf16 %v2509_v51, %v2510_v50  ;;  %v341_v0 = vand.u32 4294901760, %v2263_v52 }
  0x67   : > { %v387_v1 = vsub.f32 %v2239_v42, %v386_v53  ;;  %v394_v2 = vsub.f32 %v2241_v43, %v393_v54  ;;  %v400_v3 = vand.u32 4294901760, %v2278_v57  ;;  %v2306_v4 = vsub.f32 %v2162_v14, %v267_v19  ;;  %p1878_p3 = por %p1877_p10, %p1876_p0 }
  0x68   : > { %1531 = vmatpush3.bf16.msra.mxu1 %v2179_v18  ;;  %1627 = vmatpush3.bf16.msra.mxu0 %v2179_v18  ;;  %v2311_v5 = vsub.f32 %v2165_v15, %v270_v20  ;;  %v2314_v6 = vsub.f32 %v230_v55, %v2289_v61  ;;  %v374_v7 = vand.u32 4294901760, %v373_v58  ;;  %v381_v8 = vand.u32 4294901760, %v380_v59 }
  0x69   : > { %1533 = vmatprep.subr.bf16.mxu1 %v2201_v25  ;;  %1629 = vmatprep.subr.bf16.mxu0 %v2201_v25  ;;  %v407_v9 = vand.u32 4294901760, %v2287_v60  ;;  %v2319_v11 = vand.u32 4294901760, %v231_v62  ;;  %v1648_v12 = vpack.c.bf16 %v379_v49, %v372_v48  ;;  %v342_v16 = vsub.f32 %v2263_v52, %v341_v0  ;;  %p1879_p6 = pnand %p1878_p3, %p1872_p13 }
  0x6a   : > { %1324 = vmatprep.mubr.f32.mxu1 %v333_v32  ;;  %v351_v14 = vand.u32 4294901760, %v2314_v6  ;;  %v388_v15 = vand.u32 4294901760, %v387_v1  ;;  %v2326_v19 = vsub.f32 %v2184_v21, %v273_v26  ;;  %v395_v24 = vand.u32 4294901760, %v394_v2 }
  0x6b   : > { %v2329_v20 = vsub.f32 %v231_v62, %v2319_v11  ;;  %v401_v30 = vsub.f32 %v2278_v57, %v400_v3  ;;  %v414_v32 = vand.u32 4294901760, %v2306_v4  ;;  %v421_v33 = vand.u32 4294901760, %v2311_v5 }
  0x6c   : > { %1535 = vmatpush3.bf16.msra.mxu1 %v2201_v25  ;;  %1631 = vmatpush3.bf16.msra.mxu0 %v2201_v25  ;;  %v1552_v21 = vpack.c.bf16 %v381_v8, %v374_v7  ;;  %v408_v26 = vsub.f32 %v2287_v60, %v407_v9  ;;  %v2342_v48 = vsub.f32 %v2187_v22, %v276_v27  ;;  %v343_v59 = vand.u32 4294901760, %v342_v16 }
  0x6d   : > { %1537 = vmatprep.subr.bf16.mxu1 %v2221_v34  ;;  %1633 = vmatprep.subr.bf16.mxu0 %v2221_v34  ;;  %v361_v49 = vand.u32 4294901760, %v2329_v20  ;;  %v1652_v55 = vpack.c.bf16 %v393_v54, %v386_v53  ;;  %v352_v58 = vsub.f32 %v2314_v6, %v351_v14  ;;  %v428_v62 = vand.u32 4294901760, %v2326_v19 }
  0x6e   : > { %v2350_v1 = vsub.f32 %v2206_v28, %v279_v31  ;;  %v415_v22 = vsub.f32 %v2306_v4, %v414_v32  ;;  %v422_v27 = vsub.f32 %v2311_v5, %v421_v33  ;;  %v2360_v53 = vsub.f32 %v2209_v29, %v282_v35 }
  0x6f   : > { %v362_v2 = vsub.f32 %v2329_v20, %v361_v49  ;;  %v1556_v54 = vpack.c.bf16 %v395_v24, %v388_v15  ;;  %v402_v28 = vand.u32 4294901760, %v401_v30  ;;  %v409_v31 = vand.u32 4294901760, %v408_v26 }
  0x70   : > { %1539 = vmatpush3.bf16.msra.mxu1 %v2221_v34  ;;  %1635 = vmatpush3.bf16.msra.mxu0 %v2221_v34  ;;  %v435_v7 = vand.u32 4294901760, %v2342_v48  ;;  %v353_v8 = vand.u32 4294901760, %v352_v58  ;;  %v1656_v16 = vpack.c.bf16 %v407_v9, %v400_v3  ;;  %v429_v51 = vsub.f32 %v2326_v19, %v428_v62 }
  0x71   : > { %1541 = vmatprep.subr.bf16.mxu1 %v2256_v47  ;;  %1637 = vmatprep.subr.bf16.mxu0 %v2256_v47  ;;  %v2367_v50 = vsub.f32 %v2225_v36, %v285_v44  ;;  %v363_v29 = vand.u32 4294901760, %v362_v2  ;;  %v416_v35 = vand.u32 4294901760, %v415_v22  ;;  %v423_v15 = vand.u32 4294901760, %v422_v27 }
  0x72   : > { %v442_v24 = vand.u32 4294901760, %v2350_v1  ;;  %v449_v30 = vand.u32 4294901760, %v2360_v53  ;;  %v436_v3 = vsub.f32 %v2342_v48, %v435_v7  ;;  %v2375_v9 = vsub.f32 %v2228_v37, %v288_v45 }
  0x73   : > { %v1660_v36 = vpack.c.bf16 %v421_v33, %v414_v32  ;;  %v430_v44 = vand.u32 4294901760, %v429_v51  ;;  %v456_v58 = vand.u32 4294901760, %v2367_v50  ;;  %v2523_v45 = vand.u32 4294901760, %v2235_v40 }
  0x74   : > { %1543 = vmatpush3.bf16.msra.mxu1 %v2256_v47  ;;  %1639 = vmatpush3.bf16.msra.mxu0 %v2256_v47  ;;  %v450_v26 = vsub.f32 %v2360_v53, %v449_v30  ;;  %v463_v37 = vand.u32 4294901760, %v2375_v9  ;;  %v1664_v33 = vpack.c.bf16 %v435_v7, %v428_v62 }
  0x75   : > { %1545 = vmatprep.subr.bf16.mxu1 %v2273_v56  ;;  %1641 = vmatprep.subr.bf16.mxu0 %v2273_v56  ;;  %v2384_v51 = vsub.f32 %v2235_v40, %v2523_v45  ;;  %v457_v2 = vsub.f32 %v2367_v50, %v456_v58 }
  0x76   : > { %v464_v22 = vsub.f32 %v2375_v9, %v463_v37 }
  0x77   : > { %v470_v27 = vand.u32 4294901760, %v2384_v51  ;;  %v458_v62 = vand.u32 4294901760, %v457_v2 }
  0x78   : > { %1547 = vmatpush3.bf16.msra.mxu1 %v2273_v56  ;;  %1643 = vmatpush3.bf16.msra.mxu0 %v2273_v56 }
  0x79   : > { %1549 = vmatprep.subr.bf16.mxu1 %v2295_v63  ;;  %1645 = vmatprep.subr.bf16.mxu0 %v2295_v63  ;;  %v471_v7 = vsub.f32 %v2384_v51, %v470_v27 }
  0x7c   : > { %1551 = vmatpush3.bf16.msra.mxu1 %v2295_v63  ;;  %1647 = vmatpush3.bf16.msra.mxu0 %v2295_v63 }
  0x7d   : > { %1553 = vmatprep.subr.bf16.mxu1 %v1552_v21  ;;  %1649 = vmatprep.subr.bf16.mxu0 %v1648_v12 }
  0x7f   : > { %1325 = vmatmul.mubr.f32.vlgmr.msra.gmra.mrb[0].mxu1 %v343_v59  ;;  %1439 = vmatmul.mubr.f32.vlgmr.msra.gmra.mrb[0].mxu0 %v341_v0  ;;  %v1560_v0 = vpack.c.bf16 %v409_v31, %v402_v28  ;;  %v437_v59 = vand.u32 4294901760, %v436_v3  ;;  %v1668_v28 = vpack.c.bf16 %v449_v30, %v442_v24  ;;  %v465_v31 = vand.u32 4294901760, %v464_v22 }
  0x80   : > { %1555 = vmatpush3.bf16.msra.mxu1 %v1552_v21  ;;  %1651 = vmatpush3.bf16.msra.mxu0 %v1648_v12  ;;  %v1564_v12 = vpack.c.bf16 %v423_v15, %v416_v35  ;;  %v443_v21 = vsub.f32 %v2350_v1, %v442_v24  ;;  %v472_v35 = vand.u32 4294901760, %v471_v7  ;;  %v1588_v3 = vpack.c.bf16 %v2241_v43, %v2239_v42 }
  0x81   : > { %1557 = vmatprep.subr.bf16.mxu1 %v1556_v54  ;;  %1653 = vmatprep.subr.bf16.mxu0 %v1652_v55  ;;  %v1568_v40 = vpack.c.bf16 %v437_v59, %v430_v44 }
  0x82   : > { %1327 = vmatprep.mubr.f32.mxu1 %v353_v8  ;;  %1441 = vmatprep.mubr.f32.mxu0 %v351_v14  ;;  %v2524_v14 = vand.u32 4294901760, %v2248_v46 }
  0x83   : > { %1328 = vmatmul.mubr.f32.gmra.mrb[2].mxu1 %v363_v29  ;;  %1442 = vmatmul.mubr.f32.gmra.mrb[2].mxu0 %v361_v49  ;;  %v444_v49 = vand.u32 4294901760, %v443_v21  ;;  %v1672_v29 = vpack.c.bf16 %v463_v37, %v456_v58 }
  0x84   : > { %1559 = vmatpush3.bf16.msra.mxu1 %v1556_v54  ;;  %1655 = vmatpush3.bf16.msra.mxu0 %v1652_v55  ;;  %v2389_v32 = vsub.f32 %v2248_v46, %v2524_v14  ;;  %v451_v55 = vand.u32 4294901760, %v450_v26 }
  0x85   : > { %1561 = vmatprep.subr.bf16.mxu1 %v1560_v0  ;;  %1657 = vmatprep.subr.bf16.mxu0 %v1656_v16 }
  0x86   : > { %1362 = vmatprep.mubr.f32.mxu1 %v2171_v17  ;;  %1476 = vmatprep.mubr.f32.mxu0 %v2171_v17  ;;  %v477_v46 = vand.u32 4294901760, %v2389_v32  ;;  %v1572_v54 = vpack.c.bf16 %v451_v55, %v444_v49 }
  0x88   : > { %1563 = vmatpush3.bf16.msra.mxu1 %v1560_v0  ;;  %1659 = vmatpush3.bf16.msra.mxu0 %v1656_v16  ;;  %v478_v8 = vsub.f32 %v2389_v32, %v477_v46  ;;  %v1576_v16 = vpack.c.bf16 %v465_v31, %v458_v62  ;;  %v1676_v30 = vpack.c.bf16 %v477_v46, %v470_v27 }
  0x89   : > { %1565 = vmatprep.subr.bf16.mxu1 %v1564_v12  ;;  %1661 = vmatprep.subr.bf16.mxu0 %v1660_v36  ;;  %v1584_v0 = vpack.c.bf16 %v2232_v39, %v2230_v38  ;;  %v1592_v38 = vpack.c.bf16 %v2287_v60, %v2278_v57  ;;  %v1600_v39 = vpack.c.bf16 %v2342_v48, %v2326_v19 }
  0x8a   : > { %v479_v15 = vand.u32 4294901760, %v478_v8 }
  0x8c   : > { %1567 = vmatpush3.bf16.msra.mxu1 %v1564_v12  ;;  %1663 = vmatpush3.bf16.msra.mxu0 %v1660_v36  ;;  %v1580_v24 = vpack.c.bf16 %v479_v15, %v472_v35 }
  0x8d   : > { %1569 = vmatprep.subr.bf16.mxu1 %v1568_v40  ;;  %1665 = vmatprep.subr.bf16.mxu0 %v1664_v33 }
  0x90   : > { %1571 = vmatpush3.bf16.msra.mxu1 %v1568_v40  ;;  %1667 = vmatpush3.bf16.msra.mxu0 %v1664_v33 }
  0x91   : > { %1573 = vmatprep.subr.bf16.mxu1 %v1572_v54  ;;  %1669 = vmatprep.subr.bf16.mxu0 %v1668_v28 }
  0x94   : > { %1575 = vmatpush3.bf16.msra.mxu1 %v1572_v54  ;;  %1671 = vmatpush3.bf16.msra.mxu0 %v1668_v28 }
  0x95   : > { %1577 = vmatprep.subr.bf16.mxu1 %v1576_v16  ;;  %1673 = vmatprep.subr.bf16.mxu0 %v1672_v29 }
  0x98   : > { %1579 = vmatpush3.bf16.msra.mxu1 %v1576_v16  ;;  %1675 = vmatpush3.bf16.msra.mxu0 %v1672_v29 }
  0x99   : > { %1581 = vmatprep.subr.bf16.mxu1 %v1580_v24  ;;  %1677 = vmatprep.subr.bf16.mxu0 %v1676_v30 }
  0x9c   : > { %1583 = vmatpush3.bf16.msra.mxu1 %v1580_v24  ;;  %1679 = vmatpush3.bf16.msra.mxu0 %v1676_v30 }
  0x9d   : > { %1585 = vmatprep.subr.bf16.mxu1 %v1584_v0  ;;  %1681 = vmatprep.subr.bf16.mxu0 %v2155_v10 }
  0x9f   : > { %1363 = vmatmul.mubr.f32.vlgmr.msra.gmra.mrb[0].mxu1 %v2237_v41  ;;  %1477 = vmatmul.mubr.f32.vlgmr.msra.gmra.mrb[0].mxu0 %v2237_v41 }
  0xa0   : > { %1587 = vmatpush3.bf16.msra.mxu1 %v1584_v0  ;;  %1683 = vmatpush3.bf16.msra.mxu0 %v2155_v10  ;;  %v1596_v10 = vpack.c.bf16 %v2311_v5, %v2306_v4 }
  0xa1   : > { %1589 = vmatprep.subr.bf16.mxu1 %v1588_v3  ;;  %1685 = vmatprep.subr.bf16.mxu0 %v2159_v13 }
  0xa2   : > { %1365 = vmatprep.mubr.f32.mxu1 %v2289_v61  ;;  %1479 = vmatprep.mubr.f32.mxu0 %v2289_v61 }
  0xa3   : > { %1366 = vmatmul.mubr.f32.gmra.mrb[2].mxu1 %v2319_v11  ;;  %1480 = vmatmul.mubr.f32.gmra.mrb[2].mxu0 %v2319_v11 }
  0xa4   : > { %1591 = vmatpush3.bf16.msra.mxu1 %v1588_v3  ;;  %1687 = vmatpush3.bf16.msra.mxu0 %v2159_v13  ;;  %v1604_v13 = vpack.c.bf16 %v2360_v53, %v2350_v1 }
  0xa5   : > { %1593 = vmatprep.subr.bf16.mxu1 %v1592_v38  ;;  %1689 = vmatprep.subr.bf16.mxu0 %v2179_v18 }
  0xa6   : > { %1400 = vmatprep.mubr.f32.mxu1 %v2190_v23  ;;  %1514 = vmatprep.mubr.f32.mxu0 %v2171_v17  ;;  %v1608_v17 = vpack.c.bf16 %v2375_v9, %v2367_v50 }
  0xa8   : > { %1595 = vmatpush3.bf16.msra.mxu1 %v1592_v38  ;;  %1691 = vmatpush3.bf16.msra.mxu0 %v2179_v18  ;;  %v1612_v18 = vpack.c.bf16 %v2389_v32, %v2384_v51 }
  0xa9   : > { %1597 = vmatprep.subr.bf16.mxu1 %v1596_v10  ;;  %1693 = vmatprep.subr.bf16.mxu0 %v2201_v25 }
  0xac   : > { %1599 = vmatpush3.bf16.msra.mxu1 %v1596_v10  ;;  %1695 = vmatpush3.bf16.msra.mxu0 %v2201_v25 }
  0xad   : > { %1601 = vmatprep.subr.bf16.mxu1 %v1600_v39  ;;  %1697 = vmatprep.subr.bf16.mxu0 %v2221_v34 }
  0xb0   : > { %1603 = vmatpush3.bf16.msra.mxu1 %v1600_v39  ;;  %1699 = vmatpush3.bf16.msra.mxu0 %v2221_v34 }
  0xb1   : > { %1605 = vmatprep.subr.bf16.mxu1 %v1604_v13  ;;  %1701 = vmatprep.subr.bf16.mxu0 %v2256_v47 }
  0xb4   : > { %1607 = vmatpush3.bf16.msra.mxu1 %v1604_v13  ;;  %1703 = vmatpush3.bf16.msra.mxu0 %v2256_v47 }
  0xb5   : > { %1609 = vmatprep.subr.bf16.mxu1 %v1608_v17  ;;  %1705 = vmatprep.subr.bf16.mxu0 %v2273_v56 }
  0xb8   : > { %1611 = vmatpush3.bf16.msra.mxu1 %v1608_v17  ;;  %1707 = vmatpush3.bf16.msra.mxu0 %v2273_v56 }
  0xb9   : > { %1613 = vmatprep.subr.bf16.mxu1 %v1612_v18  ;;  %1709 = vmatprep.subr.bf16.mxu0 %v2295_v63 }
  0xbc   : > { %1615 = vmatpush3.bf16.msra.mxu1 %v1612_v18  ;;  %1711 = vmatpush3.bf16.msra.mxu0 %v2295_v63 }
  0xbf   : > { %1401 = vmatmul.mubr.f32.vlgmr.msra.gmra.mrb[0].mxu1 %v2263_v52  ;;  %1515 = vmatmul.mubr.f32.vlgmr.msra.gmra.mrb[0].mxu0 %v2237_v41 }
  0xc0   : > { %1403 = vmatprep.mubr.f32.mxu1 %v2314_v6  ;;  %1517 = vmatprep.mubr.f32.mxu0 %v2289_v61 }
  0xc3   : > { %1404 = vmatmul.mubr.f32.gmra.mrb[2].mxu1 %v2329_v20  ;;  %1518 = vmatmul.mubr.f32.gmra.mrb[2].mxu0 %v2319_v11 }
 0x192   : > { %v1402_v23 = vpop.f32.mrb[0].mxu1  ;;  %v1516_v25 = vpop.f32.mrb[0].mxu0 }
 0x193   : > { %v1712_v34 = vadd.f32 %v1516_v25, %v1402_v23  ;;  %v638_v42 = vpop.f32.mrb[1].mxu1  ;;  %v996_v43 = vpop.f32.mrb[1].mxu0 }
 0x194   : > { %v1713_v47 = vadd.f32 %v996_v43, %v638_v42 }
 0x195   : > { %1034 = vst [vmem:[%s212_s19 + $0x8] sm:$0xff] %v1712_v34 }
 0x196   : > { %1033 = vst [vmem:[%s212_s19] sm:$0xff] %v1713_v47  ;;  %v1405_v41 = vpop.f32.mrb[2].mxu1  ;;  %v1519_v50 = vpop.f32.mrb[2].mxu0 }
 0x197   : > { %v1714_v52 = vadd.f32 %v1519_v50, %v1405_v41  ;;  %v652_v56 = vpop.f32.mrb[3].mxu1  ;;  %v1008_v57 = vpop.f32.mrb[3].mxu0 }
 0x198   : > { %v1715_v60 = vadd.f32 %v1008_v57, %v652_v56 }
 0x199   : > { %1036 = vst [vmem:[%s212_s19 + $0x18] sm:$0xff] %v1714_v52 }
 0x19a   : > { %1035 = vst [vmem:[%s212_s19 + $0x10] sm:$0xff] %v1715_v60 }
 0x19b   : > { %1882 = shalt.err (!%p1879_p6)
}
 0x19c   : > { %s1883_s24 = scalar_lea.hbm %s2452_s6, 512  ;;  %s1887_s26 = scalar_lea.hbm %s2502_s2, 1536 }
 0x19d   : > { %p1884_p1 = scmp.ne.s32.totalorder %s2452_s6, %s1883_s24  ;;  %p1888_p12 = scmp.lt.u32.totalorder %s2452_s6, %s2502_s2 }
 0x19e   : > { %p1889_p2 = scmp.lt.u32.totalorder %s1887_s26, %s1883_s24  ;;  %p1891_p9 = scmp.lt.u32.totalorder %s1883_s24, %s2452_s6 }
 0x19f   : > { %p1885_p5 = pnand %p1884_p1, %p2525_p11 }
 0x1a0   : > { %p1890_p8 = por %p1889_p2, %p1888_p12 }
 0x1a1   : > { %p1886_p7 = pneg %p1885_p5 }
 0x1a2   : > { %p1892_p4 = por %p1891_p9, %p1890_p8 }
 0x1a4   : > { %p1893_p13 = pnand %p1892_p4, %p1886_p7 }
 0x1a6   : > { %1896 = shalt.err (!%p1893_p13)
}
 0x1a7   : > { %s1963_s17 = smov 128   ;;  %s1964_s19 = smov 384  }
 0x1a8   : > { %s1965_s8 = smov 8  }
 0x1a9   : > { %1738 = dma.vmem_to_hbm [thread:$0]  (%p2525_p11), %s2447_s22, 512, %s2452_s6, %s1038_s12, %s1963_s17, %s1964_s19, %s1965_s8  }
 0x1aa PF: > { %p1755_p0 = scmp.ge.s32.totalorder %s1955_s14, 2  ;;  %s1068_s15 = sand.u32 1, %s1935_s9  }
 0x1ab   : > { %p2526_p10 = scmp.ne.s32.totalorder %s2515_s21, 0  ;;  %s1069_s5 = scalar_lea.sflag [#allocation5], %s1068_s15 }
 0x1ad   : > { %p1749_p3 = pnand %p1755_p0, %p2526_p10 }
 0x1af   : > { %1930 = dma.done.wait (!%p1749_p3), %s1069_s5, 512  }
 0x1b0   : > { %1932 = vsyncadd (!%p1749_p3), %s1069_s5, 4294966784  ;;  %s19_s14 = sadd.s32 1, %s1955_s14   ;;  %s2527_s9 = smov %s1939_s10 }
 0x1b1   : > { %p16_p6 = scmp.ge.s32.totalorder %s19_s14, 5   ;;  %s2528_s10 = smov %s1943_s11 }
 0x1b2   : > { %s2529_s11 = smov %s2094_s7  ;;  %s2530_s12 = smov %s1951_s13 }
 0x1b3   : > { %s2531_s13 = smov %s2533_s27  ;;  %18 = sbr.rel (!%p16_p6) target bundleno = 7 (0x7), region = 87 }
 0x1ba   :  { %1074 = vsyncpa [#allocation4], 1 }
 0x1bb   :  { %1076 = vsyncpa [#allocation4 + $0x1], 1 }
 0x1bc   :  { %1077 = vsyncpa [#allocation7], 1 }
 0x1bd   :  { %1079 = vsyncpa [#allocation7 + $0x1], 1 }
 0x1be   :  { %1080 = vsyncpa [#allocation5], 1 }
 0x1bf   :  { %1082 = vsyncpa [#allocation5 + $0x1], 1 }

</bundles_post_ra>
